<compile_context>
chip_gen: v7x
topology: tpu7x:2x2x1
jax: 0.10.0
libtpu: 0.0.40
codegen_flags: <defaults>
</compile_context>

<pallas_src>
import jax
import jax.numpy as jnp
from jax.experimental import pallas as pl
from jax.experimental.pallas import tpu as pltpu


def _gated_fusion_kernel(img_ref, gnn_ref,
                         wp1_ref, wp2_ref, bp_ref,
                         wg_ref, bg_ref,
                         out_ref):
    f32 = jnp.float32
    H = out_ref.shape[-1]

    # Widen streamed activations (f32 or bf16) to f32 for the VPU epilogue;
    # the MXU accumulates in f32 via preferred_element_type either way.
    img = img_ref[...].astype(f32)
    gnn = gnn_ref[...].astype(f32)

    # [x1 | x2] in one (TB, 2H) value:  img @ [wp1|0] + gnn @ [0|wp2] + [bp1|bp2]
    x12 = (
        jnp.dot(img, wp1_ref[...], preferred_element_type=f32)
        + jnp.dot(gnn, wp2_ref[...], preferred_element_type=f32)
        + bp_ref[...]
    )
    # gate(cat([x1, x2], dim=1)) as a single K=2H matmul.
    gate = jax.nn.sigmoid(
        jnp.dot(x12, wg_ref[...], preferred_element_type=f32) + bg_ref[...]
    )
    x1 = x12[:, :H]
    x2 = x12[:, H:]
    # Blend: x2 + gate*(x1 - x2) == gate*x1 + (1-gate)*x2, one fewer VPU op/elem.
    out_ref[...] = (x2 + gate * (x1 - x2)).astype(out_ref.dtype)


def _pick_tile_b(B, tile_b):
    """Batch-tile choice: big tiles to amortize per-step overhead, >=2 grid steps
    for dual-TensorCore sharding when the batch is large, sublane-aligned blocks."""
    tb = max(1, min(tile_b, B))
    if tb == B and B >= 4096:
        # Whole batch would be one grid step -> split so both v7x TCs get work.
        tb = -(-B // 2)
    if tb < B:
        # Multi-step grid: block's second-to-last dim must be tile-aligned.
        # Multiple of 16 covers both f32 (8,128) and bf16 (16,128) layouts.
        tb = max(16, (tb // 16) * 16)
    return tb


def attention_gate_fusion(img, gnn, params, *, tile_b=8192, out_dtype=jnp.float32):
    """Fused forward pass. img: (B, img_dim), gnn: (B, gnn_dim) -> (B, H)."""
    B, d1 = img.shape
    _, d2 = gnn.shape
    H = params["wp1"].shape[1]
    f32 = jnp.float32

    # ---- wrapper-side weight fusion (tiny, done once per call) ----
    wp1p = jnp.concatenate([params["wp1"].astype(f32), jnp.zeros((d1, H), f32)], axis=1)
    wp2p = jnp.concatenate([jnp.zeros((d2, H), f32), params["wp2"].astype(f32)], axis=1)
    bp = jnp.concatenate([params["bp1"], params["bp2"]], axis=1).astype(f32)     # (1, 2H)
    wg = jnp.concatenate([params["wg1"], params["wg2"]], axis=0).astype(f32)     # (2H, H)
    bg = params["bg"].astype(f32)                                                # (1, H)
    # TODO(synk): if img/gnn ever arrive pre-concatenated from the producer, swap
    # the two zero-padded dots for one block-diagonal K=d1+d2 matmul.

    tb = _pick_tile_b(B, tile_b)
    grid = (pl.cdiv(B, tb),)

    # ---- explicit VMEM budget: double-buffered in/out blocks + f32 temporaries ----
    in_itemsize = jnp.dtype(img.dtype).itemsize
    out_itemsize = jnp.dtype(out_dtype).itemsize
    vmem_est = (
        2 * tb * (d1 + d2) * in_itemsize          # double-buffered input blocks
        + 2 * tb * H * out_itemsize               # double-buffered output blocks
        + tb * (4 * H) * 4                        # x12 (2H) + gate/blend (~2H) f32 temps
        + (wp1p.size + wp2p.size + bp.size + wg.size + bg.size) * 4
        + (4 << 20)                               # headroom for Mosaic scratch
    )
    vmem_limit = int(min(max(vmem_est, 32 << 20), 64 << 20))

    def rows(d):  # batch-tiled activations / output
        return pl.BlockSpec((tb, d), lambda i: (i, 0))

    def resident(a):  # VMEM-resident weights (same block every grid step)
        return pl.BlockSpec(a.shape, lambda i: (0, 0))

    return pl.pallas_call(
        _gated_fusion_kernel,
        out_shape=jax.ShapeDtypeStruct((B, H), out_dtype),
        grid=grid,
        in_specs=[rows(d1), rows(d2),
                  resident(wp1p), resident(wp2p), resident(bp),
                  resident(wg), resident(bg)],
        out_specs=pl.BlockSpec((tb, H), lambda i: (i, 0)),
        compiler_params=pltpu.CompilerParams(
            dimension_semantics=("parallel",),   # shard batch across TCs on v7x
            vmem_limit_bytes=vmem_limit,
        ),
    )(img, gnn, wp1p, wp2p, bp, wg, bg)


def init_params(key, img_dim, gnn_dim, hidden_dim):
    """Deterministic synthetic parameters (stored as [in, out] for x @ W)."""
    ks = jax.random.split(key, 16)
    u = lambda k, shape, s: (jax.random.uniform(k, shape, jnp.float32) - 0.5) * 2.0 * s
    return {
        # SelfAttention(img): W (img_dim -> H), V (H -> 1)  [dead path, kept for reference]
        "w_img": u(ks[0], (img_dim, hidden_dim), 0.2),
        "b_img": u(ks[1], (1, hidden_dim), 0.2),
        "v_img": u(ks[2], (hidden_dim, 1), 0.2),
        "bv_img": u(ks[3], (1, 1), 0.2),
        # SelfAttention(gnn)
        "w_gnn": u(ks[4], (gnn_dim, hidden_dim), 0.2),
        "b_gnn": u(ks[5], (1, hidden_dim), 0.2),
        "v_gnn": u(ks[6], (hidden_dim, 1), 0.2),
        "bv_gnn": u(ks[7], (1, 1), 0.2),
        # GatedFusion
        "wp1": u(ks[8], (img_dim, hidden_dim), 0.2),
        "bp1": u(ks[9], (1, hidden_dim), 0.2),
        "wp2": u(ks[10], (gnn_dim, hidden_dim), 0.2),
        "bp2": u(ks[11], (1, hidden_dim), 0.2),
        # gate Linear(2H -> H) split into the x1-half and x2-half
        "wg1": u(ks[12], (hidden_dim, hidden_dim), 0.2),
        "wg2": u(ks[13], (hidden_dim, hidden_dim), 0.2),
        "bg": u(ks[14], (1, hidden_dim), 0.2),
    }


def reference_jax(img, gnn, p):
    """Pure-JAX mirror of the PyTorch forward pass (keeps the attention path)."""
    def self_att(x, w, b, v, bv):
        energy = jnp.tanh(x @ w + b)
        scores = energy @ v + bv
        weights = jax.nn.softmax(scores, axis=1)   # size-1 axis -> all ones
        return weights * x

    img_att = self_att(img, p["w_img"], p["b_img"], p["v_img"], p["bv_img"])
    gnn_att = self_att(gnn, p["w_gnn"], p["b_gnn"], p["v_gnn"], p["bv_gnn"])
    x1 = img_att @ p["wp1"] + p["bp1"]
    x2 = gnn_att @ p["wp2"] + p["bp2"]
    gate = jax.nn.sigmoid(x1 @ p["wg1"] + x2 @ p["wg2"] + p["bg"])
    return gate * x1 + (1.0 - gate) * x2


if __name__ == "__main__":
    IMG_DIM, GNN_DIM, HIDDEN = 16, 24, 32
    key = jax.random.PRNGKey(0)
    k_img, k_gnn, k_params = jax.random.split(key, 3)
    params = init_params(k_params, IMG_DIM, GNN_DIM, HIDDEN)

    # --- small case: single grid step (B=4) ---
    B = 4
    img = jax.random.normal(k_img, (B, IMG_DIM), jnp.float32)
    gnn = jax.random.normal(k_gnn, (B, GNN_DIM), jnp.float32)
    out = attention_gate_fusion(img, gnn, params)
    jax.block_until_ready(out)
    ref = reference_jax(img, gnn, params)
    assert out.shape == (B, HIDDEN)
    assert jnp.max(jnp.abs(out - ref)) < 1e-4, "mismatch vs pure-JAX reference (B=4)"

    # --- multi-step grid: exercise batch tiling / pipelining (grid=4) ---
    B2 = 256
    img2 = jax.random.normal(jax.random.fold_in(k_img, 1), (B2, IMG_DIM), jnp.float32)
    gnn2 = jax.random.normal(jax.random.fold_in(k_gnn, 1), (B2, GNN_DIM), jnp.float32)
    out2 = attention_gate_fusion(img2, gnn2, params, tile_b=64)
    jax.block_until_ready(out2)
    ref2 = reference_jax(img2, gnn2, params)
    assert out2.shape == (B2, HIDDEN)
    assert jnp.max(jnp.abs(out2 - ref2)) < 1e-4, "mismatch vs pure-JAX reference (B=256)"

    # --- larger case with default tile: exercises the >=2-grid-step split ---
    B3 = 4096
    img3 = jax.random.normal(jax.random.fold_in(k_img, 2), (B3, IMG_DIM), jnp.float32)
    gnn3 = jax.random.normal(jax.random.fold_in(k_gnn, 2), (B3, GNN_DIM), jnp.float32)
    out3 = attention_gate_fusion(img3, gnn3, params)
    jax.block_until_ready(out3)
    ref3 = reference_jax(img3, gnn3, params)
    assert out3.shape == (B3, HIDDEN)
    assert jnp.max(jnp.abs(out3 - ref3)) < 1e-4, "mismatch vs pure-JAX reference (B=4096)"

    # --- bf16 input streaming (dtype-agnostic kernel; halves input HBM traffic) ---
    img4 = img2.astype(jnp.bfloat16)
    gnn4 = gnn2.astype(jnp.bfloat16)
    out4 = attention_gate_fusion(img4, gnn4, params, tile_b=64)
    jax.block_until_ready(out4)
    ref4 = reference_jax(img4.astype(jnp.float32), gnn4.astype(jnp.float32), params)
    assert jnp.max(jnp.abs(out4 - ref4)) < 1e-4, "mismatch vs pure-JAX reference (bf16 inputs)"

    print("KERNEL_OK")
</pallas_src>

<mosaic_0001>
module attributes {stable_mosaic.version = 11 : i64} {
  func.func @_gated_fusion_kernel(%arg0: i32, %arg1: memref<4x16xf32, #tpu.memory_space<vmem>>, %arg2: memref<4x24xf32, #tpu.memory_space<vmem>>, %arg3: memref<16x64xf32, #tpu.memory_space<vmem>>, %arg4: memref<24x64xf32, #tpu.memory_space<vmem>>, %arg5: memref<1x64xf32, #tpu.memory_space<vmem>>, %arg6: memref<64x32xf32, #tpu.memory_space<vmem>>, %arg7: memref<1x32xf32, #tpu.memory_space<vmem>>, %arg8: memref<4x32xf32, #tpu.memory_space<vmem>>) attributes {dimension_semantics = [#tpu.dimension_semantics<parallel>], iteration_bounds = array<i64: 1>, scalar_prefetch = 0 : i64, scratch_operands = 0 : i64, tpu.core_type = #tpu.core_type<tc>, window_params = [{transform_indices = @transform_0, window_bounds = array<i64: 4, 16>}, {transform_indices = @transform_1, window_bounds = array<i64: 4, 24>}, {pipeline_mode = #tpu.pipeline_mode<synchronous>, transform_indices = @transform_2, window_bounds = array<i64: 16, 64>}, {pipeline_mode = #tpu.pipeline_mode<synchronous>, transform_indices = @transform_3, window_bounds = array<i64: 24, 64>}, {pipeline_mode = #tpu.pipeline_mode<synchronous>, transform_indices = @transform_4, window_bounds = array<i64: 1, 64>}, {pipeline_mode = #tpu.pipeline_mode<synchronous>, transform_indices = @transform_5, window_bounds = array<i64: 64, 32>}, {pipeline_mode = #tpu.pipeline_mode<synchronous>, transform_indices = @transform_6, window_bounds = array<i64: 1, 32>}, {transform_indices = @transform_7, window_bounds = array<i64: 4, 32>}]} {
    %c0 = arith.constant 0 : index
    %c0_0 = arith.constant 0 : index
    %0 = vector.load %arg1[%c0, %c0_0] : memref<4x16xf32, #tpu.memory_space<vmem>>, vector<4x16xf32>
    %c0_1 = arith.constant 0 : index
    %c0_2 = arith.constant 0 : index
    %1 = vector.load %arg2[%c0_1, %c0_2] : memref<4x24xf32, #tpu.memory_space<vmem>>, vector<4x24xf32>
    %c0_3 = arith.constant 0 : index
    %c0_4 = arith.constant 0 : index
    %2 = vector.load %arg3[%c0_3, %c0_4] : memref<16x64xf32, #tpu.memory_space<vmem>>, vector<16x64xf32>
    %cst = arith.constant dense<0.000000e+00> : vector<4x64xf32>
    %3 = tpu.matmul %0, %2, %cst {dimension_numbers = #tpu.dot_dimension_numbers<[1], [0], [0], [1], [0, 0, 1, 1], [], []>} : vector<4x16xf32>, vector<16x64xf32>, vector<4x64xf32> -> vector<4x64xf32>
    %c0_5 = arith.constant 0 : index
    %c0_6 = arith.constant 0 : index
    %4 = vector.load %arg4[%c0_5, %c0_6] : memref<24x64xf32, #tpu.memory_space<vmem>>, vector<24x64xf32>
    %cst_7 = arith.constant dense<0.000000e+00> : vector<4x64xf32>
    %5 = tpu.matmul %1, %4, %cst_7 {dimension_numbers = #tpu.dot_dimension_numbers<[1], [0], [0], [1], [0, 0, 1, 1], [], []>} : vector<4x24xf32>, vector<24x64xf32>, vector<4x64xf32> -> vector<4x64xf32>
    %6 = arith.addf %3, %5 : vector<4x64xf32>
    %c0_8 = arith.constant 0 : index
    %c0_9 = arith.constant 0 : index
    %7 = vector.load %arg5[%c0_8, %c0_9] : memref<1x64xf32, #tpu.memory_space<vmem>>, vector<1x64xf32>
    %8 = vector.broadcast %7 : vector<1x64xf32> to vector<4x64xf32>
    %9 = arith.addf %6, %8 : vector<4x64xf32>
    %c0_10 = arith.constant 0 : index
    %c0_11 = arith.constant 0 : index
    %10 = vector.load %arg6[%c0_10, %c0_11] : memref<64x32xf32, #tpu.memory_space<vmem>>, vector<64x32xf32>
    %cst_12 = arith.constant dense<0.000000e+00> : vector<4x32xf32>
    %11 = tpu.matmul %9, %10, %cst_12 {dimension_numbers = #tpu.dot_dimension_numbers<[1], [0], [0], [1], [0, 0, 1, 1], [], []>} : vector<4x64xf32>, vector<64x32xf32>, vector<4x32xf32> -> vector<4x32xf32>
    %c0_13 = arith.constant 0 : index
    %c0_14 = arith.constant 0 : index
    %12 = vector.load %arg7[%c0_13, %c0_14] : memref<1x32xf32, #tpu.memory_space<vmem>>, vector<1x32xf32>
    %13 = vector.broadcast %12 : vector<1x32xf32> to vector<4x32xf32>
    %14 = arith.addf %11, %13 : vector<4x32xf32>
    %15 = arith.negf %14 : vector<4x32xf32>
    %16 = math.exp %15 : vector<4x32xf32>
    %cst_15 = arith.constant 1.000000e+00 : f32
    %17 = vector.broadcast %cst_15 : f32 to vector<4x32xf32>
    %18 = arith.addf %17, %16 : vector<4x32xf32>
    %19 = arith.divf %17, %18 : vector<4x32xf32>
    %20 = vector.extract_strided_slice %9 {offsets = [0, 0], sizes = [4, 32], strides = [1, 1]} : vector<4x64xf32> to vector<4x32xf32>
    %21 = vector.extract_strided_slice %9 {offsets = [0, 32], sizes = [4, 32], strides = [1, 1]} : vector<4x64xf32> to vector<4x32xf32>
    %22 = arith.subf %20, %21 : vector<4x32xf32>
    %23 = arith.mulf %19, %22 : vector<4x32xf32>
    %24 = arith.addf %21, %23 : vector<4x32xf32>
    %c0_16 = arith.constant 0 : index
    %c0_17 = arith.constant 0 : index
    %25 = vector.load %arg8[%c0_16, %c0_17] : memref<4x32xf32, #tpu.memory_space<vmem>>, vector<4x32xf32>
    tpu.vector_store %arg8[%c0_16, %c0_17], %24 {strides = array<i32>} : memref<4x32xf32, #tpu.memory_space<vmem>>, vector<4x32xf32>,
    return
  }
  func.func @transform_0(%arg0: i32) -> (i32, i32) {
    %c0_i32 = arith.constant 0 : i32
    %c0_i32_0 = arith.constant 0 : i32
    return %arg0, %c0_i32 : i32, i32
  }
  func.func @transform_1(%arg0: i32) -> (i32, i32) {
    %c0_i32 = arith.constant 0 : i32
    %c0_i32_0 = arith.constant 0 : i32
    return %arg0, %c0_i32 : i32, i32
  }
  func.func @transform_2(%arg0: i32) -> (i32, i32) {
    %c0_i32 = arith.constant 0 : i32
    %c0_i32_0 = arith.constant 0 : i32
    %c0_i32_1 = arith.constant 0 : i32
    return %c0_i32, %c0_i32_0 : i32, i32
  }
  func.func @transform_3(%arg0: i32) -> (i32, i32) {
    %c0_i32 = arith.constant 0 : i32
    %c0_i32_0 = arith.constant 0 : i32
    %c0_i32_1 = arith.constant 0 : i32
    return %c0_i32, %c0_i32_0 : i32, i32
  }
  func.func @transform_4(%arg0: i32) -> (i32, i32) {
    %c0_i32 = arith.constant 0 : i32
    %c0_i32_0 = arith.constant 0 : i32
    %c0_i32_1 = arith.constant 0 : i32
    return %c0_i32, %c0_i32_0 : i32, i32
  }
  func.func @transform_5(%arg0: i32) -> (i32, i32) {
    %c0_i32 = arith.constant 0 : i32
    %c0_i32_0 = arith.constant 0 : i32
    %c0_i32_1 = arith.constant 0 : i32
    return %c0_i32, %c0_i32_0 : i32, i32
  }
  func.func @transform_6(%arg0: i32) -> (i32, i32) {
    %c0_i32 = arith.constant 0 : i32
    %c0_i32_0 = arith.constant 0 : i32
    %c0_i32_1 = arith.constant 0 : i32
    return %c0_i32, %c0_i32_0 : i32, i32
  }
  func.func @transform_7(%arg0: i32) -> (i32, i32) {
    %c0_i32 = arith.constant 0 : i32
    %c0_i32_0 = arith.constant 0 : i32
    return %arg0, %c0_i32 : i32, i32
  }
}

</mosaic_0001>

<bundles_post_ra>
// kernel: tpu_custom_call.1
= control target key start
LH: loop header
LB: loop body
LE: loop exit
PB: predicated region body
PF: predicated region fallthrough
CT: control target
= control target key end

     0   :  { %v424_v2 = vmov 0.0|0.0   ;;  %vm425_vm0 = vmmov 0   ;;  %v426_v4 = vmov 0.0   ;;  %s536_s0 = inlined_call_operand.vmem [shape: f32[4,16], index: 0, kind: input, shape index: {}]   ;;  %s537_s1 = inlined_call_operand.vmem [shape: f32[4,24], index: 1, kind: input, shape index: {}]   ;;  %s538_s2 = inlined_call_operand.vmem [shape: f32[16,64], index: 2, kind: input, shape index: {}]   ;;  %s539_s3 = inlined_call_operand.vmem [shape: f32[24,64], index: 3, kind: input, shape index: {}]   ;;  %s540_s4 = inlined_call_operand.vmem [shape: f32[1,64], index: 4, kind: input, shape index: {}]   ;;  %s541_s5 = inlined_call_operand.vmem [shape: f32[64,32], index: 5, kind: input, shape index: {}]   ;;  %s542_s6 = inlined_call_operand.vmem [shape: f32[1,32], index: 6, kind: input, shape index: {}]   ;;  %s543_s7 = inlined_call_operand.hbm [shape: f32[4,32], index: 7, kind: output, shape index: {}]  }
   0x1   :  { %v31_v0 = vld [vmem:[%s539_s3] sm:$0xff]  ;;  %v32_v1 = vld [vmem:[%s539_s3 + $0x8] sm:$0xff]  ;;  %372 = vmatprep.subr.bf16.mxu0 %v424_v2  ;;  %343 = vmatprep.mubr.msk.f32.mxu0 %vm425_vm0, %v426_v4  ;;  %v192_v10 = vld [vmem:[%s541_s5 + $0x10] sm:$0xff] }
   0x2   :  { %v373_v3 = vpack.c.bf16 %v32_v1, %v31_v0  ;;  %v29_v5 = vld [vmem:[%s538_s2] sm:$0xff]  ;;  %v30_v6 = vld [vmem:[%s538_s2 + $0x8] sm:$0xff]  ;;  %378 = vmatprep.subr.bf16.mxu1 %v424_v2  ;;  %369 = vmatprep.mubr.msk.f32.mxu1 %vm425_vm0, %v426_v4  ;;  %v193_v11 = vld [vmem:[%s541_s5 + $0x18] sm:$0xff] }
   0x3   :  { %v190_v7 = vld [vmem:[%s541_s5] sm:$0xff]  ;;  %v191_v8 = vld [vmem:[%s541_s5 + $0x8] sm:$0xff] }
   0x4   :  { %374 = vmatpush3.bf16.msra.mxu0 %v373_v3  ;;  %v379_v9 = vpack.c.bf16 %v191_v8, %v190_v7 }
   0x5   :  { %12 = vsyncpa [#allocation3], 0  ;;  %341 = vmatprep.subr.mxu0 %v426_v4  ;;  %v33_v12 = vld [vmem:[%s539_s3 + $0x10] sm:$0xff]  ;;  %v28_v13 = vld [vmem:[%s537_s1] sm:$0xf]  ;;  %vm34_vm1 = vcmask 195584   ;;  %v376_v14 = vpack.c.bf16 %v30_v6, %v29_v5  ;;  %v382_v15 = vpack.c.bf16 %v193_v11, %v192_v10 }
   0x6   :  { %380 = vmatpush3.bf16.msra.mxu1 %v379_v9  ;;  %v27_v16 = vld [vmem:[%s536_s0] sm:$0xf]  ;;  %vm108_vm2 = vcmask 130048   ;;  %v195_v18 = vld [vmem:[%s541_s5 + $0x28] sm:$0xff]  ;;  %v196_v20 = vld [vmem:[%s541_s5 + $0x30] sm:$0xff]  ;;  %vm205_vm3 = vcmask 523264  }
   0x7   :  { %381 = vmatprep.subr.bf16.mxu1 %v424_v2  ;;  %v194_v17 = vld [vmem:[%s541_s5 + $0x20] sm:$0xff]  ;;  %v197_v21 = vld [vmem:[%s541_s5 + $0x38] sm:$0xff]  ;;  %s427_s29 = smov 96   ;;  %s429_s5 = smov [#allocation2]   ;;  %vm299_vm4 = vcmask 257024  }
   0x8   :  { %342 = vmatpush3.msra.mxu0 %v33_v12  ;;  %v385_v19 = vpack.c.bf16 %v195_v18, %v194_v17  ;;  %v388_v22 = vpack.c.bf16 %v197_v21, %v196_v20  ;;  %v317_v26 = vld [vmem:[%s540_s4] ss:$0 sm:$0xff]  ;;  %s428_s4 = smov 32   ;;  %s307_s9 = sshll.u32 %s429_s5, 4  ;;  %s308_s9 = int_to_ptr.vmem [resolvable:$true] %s307_s9 }
   0x9   :  { %344 = vmatmul.mubr.msk.f32.vlgmr.msra.gmra.mrb[0].mxu0 %vm34_vm1, %v28_v13  ;;  %375 = vmatprep.subr.bf16.mxu0 %v424_v2  ;;  %v318_v30 = vld [vmem:[%s542_s6] ss:$0 sm:$0xff]  ;;  %s400_s6 = scalar_lea.vmem %s308_s9, 64  ;;  %p405_p1 = scmp.lt.s32.totalorder %s308_s9, %s308_s9 }
   0xa   :  { %377 = vmatpush3.bf16.msra.mxu0 %v376_v14  ;;  %350 = vmatprep.mubr.msk.f32.mxu0 %vm425_vm0, %v426_v4  ;;  %p401_p0 = scmp.ne.s32.totalorder %s308_s9, %s400_s6  ;;  %p406_p2 = scmp.lt.s32.totalorder %s400_s6, %s400_s6 }
   0xb   :  { %383 = vmatpush3.bf16.msra.mxu1 %v382_v15 }
   0xc   :  { %384 = vmatprep.subr.bf16.mxu1 %v424_v2  ;;  %p407_p3 = por %p406_p2, %p405_p1 }
   0xd   :  { %351 = vmatmul.mubr.msk.f32.vlgmr.msra.gmra.mrb[2].mxu0 %vm108_vm2, %v27_v16 }
   0xe   :  { %p408_p4 = pnand %p407_p3, %p401_p0 }
   0xf   :  { %386 = vmatpush3.bf16.msra.mxu1 %v385_v19 }
  0x10   :  { %387 = vmatprep.subr.bf16.mxu1 %v424_v2 }
  0x13   :  { %389 = vmatpush3.bf16.msra.mxu1 %v388_v22 }
  0xdc   :  { %v104_v23 = vpop.f32.mrb[0].mxu0 }
  0xdd   :  { %v345_v24 = vpop.f32.mrb[1].mxu0 }
  0xe0   :  { %v178_v25 = vpop.f32.mrb[2].mxu0 }
  0xe1   :  { %v179_v27 = vadd.f32 %v178_v25, %v104_v23  ;;  %v352_v28 = vpop.f32.mrb[3].mxu0 }
  0xe3   :  { %v189_v29 = vadd.f32 %v317_v26, %v179_v27 }
  0xe5   :  { %285 = vrot.lane.b32.xlu0 %v189_v29, %s427_s29  ;;  %370 = vmatmul.mubr.msk.f32.vlgmr.msra.gmra.mrb[0].mxu1 %vm205_vm3, %v189_v29 }
 0x157   :  { %v286_v37 = vpop.permute.xlu0 %285 }
 0x158   :  { %v288_v38 = vsub.f32 %v189_v29, %v286_v37 }
 0x1b8   :  { %v275_v31 = vpop.f32.mrb[0].mxu1 }
 0x1b9   :  { %v276_v32 = vadd.f32 %v318_v30, %v275_v31  ;;  %v371_v33 = vpop.f32.mrb[1].mxu1 }
 0x1bb   :  { %v320_v34 = vmul.f32 -1.442695, %v276_v32 }
 0x1bd   :  { %396 = vpow2.f32 %v320_v34 }
 0x1c7   :  { %v397_v35 = vpop.eup %396 }
 0x1c8   :  { %v282_v36 = vadd.f32 1.0, %v397_v35 }
 0x1ca   :  { %398 = vrcp.f32 %v282_v36 }
 0x1d4   :  { %v399_v39 = vpop.eup %398 }
 0x1d5   :  { %v289_v40 = vmul.f32 %v399_v39, %v288_v38 }
 0x1d7   :  { %291 = vrot.lane.b32.xlu0 %v289_v40, %s428_s4 }
 0x249   :  { %v292_v41 = vpop.permute.xlu0 %291 }
 0x24a   :  { %v294_v42 = vadd.f32 %v292_v41, %v189_v29 }
 0x24c   :  { %296 = vrot.lane.b32.xlu1 %v294_v42, %s427_s29 }
 0x2be   :  { %v297_v43 = vpop.permute.xlu1 %296 }
 0x2bf   :  { %300 = vst.msk [vmem:[#allocation2] sm:$0xf] %vm299_vm4, %v297_v43 }
 0x2c0   :  { %411 = shalt.err (!%p408_p4)
}
 0x2c1   :  { %s412_s12 = scalar_lea.hbm %s543_s7, 64 }
 0x2c2   :  { %p413_p5 = scmp.ne.s32.totalorder %s543_s7, %s412_s12  ;;  %p416_p6 = scmp.lt.u32.totalorder %s412_s12, %s543_s7 }
 0x2c4   :  { %p418_p7 = pnand %p416_p6, %p413_p5 }
 0x2c6   :  { %421 = shalt.err (!%p418_p7)
}
 0x2c7   :  { %310 = dma.vmem_to_hbm [thread:$0]  %s308_s9, 64, %s543_s7, [#allocation3]  }
 0x2c8   :  { %422 = dma.done.wait [#allocation3], 64  }
 0x2c9   :  { %423 = vsyncadd [#allocation3], 4294967232 }
 0x2ca   :  { %314 = vsyncpa [#allocation3], 1 }

</bundles_post_ra>
